<compile_context>
chip_gen: v5e
topology: v5e:2x2
jax: 0.10.0
libtpu: 0.0.40
codegen_flags: <defaults>
</compile_context>

<pallas_src>
import functools
import math

import jax
import jax.numpy as jnp
from jax import lax
from jax.experimental import pallas as pl
from jax.experimental.pallas import tpu as pltpu

_LN_EPS = 1e-5
_GELU_C = 0.7978845608028654  # sqrt(2 / pi)
_VMEM_LIMIT = 64 * 1024 * 1024


def _pick_tile(n, candidates):
    """Largest candidate tile that divides n; falls back to the full extent."""
    for c in candidates:
        if n >= c and n % c == 0:
            return c
    return n


def _layernorm(x_f32, gamma, beta):
    mu = jnp.mean(x_f32, axis=-1, keepdims=True)
    xc = x_f32 - mu
    var = jnp.mean(xc * xc, axis=-1, keepdims=True)
    return xc * lax.rsqrt(var + _LN_EPS) * gamma + beta


# ----------------------------------------------------------------------------
# Kernel A: ln_1 + fused QKV projection
# ----------------------------------------------------------------------------
def _ln_qkv_kernel(x_ref, g_ref, b_ref, w_ref, bqkv_ref, o_ref):
    xn = _layernorm(x_ref[...].astype(jnp.float32), g_ref[...], b_ref[...])
    qkv = jnp.dot(xn.astype(w_ref.dtype), w_ref[...],
                  preferred_element_type=jnp.float32) + bqkv_ref[...]
    o_ref[...] = qkv.astype(o_ref.dtype)


def _ln_qkv(x2, g, b, w_qkv, b_qkv):
    M, C = x2.shape
    O = w_qkv.shape[1]  # 3C
    tm = _pick_tile(M, (512, 256, 128, 64, 32, 16, 8))
    return pl.pallas_call(
        _ln_qkv_kernel,
        out_shape=jax.ShapeDtypeStruct((M, O), x2.dtype),
        grid_spec=pltpu.PrefetchScalarGridSpec(
            num_scalar_prefetch=0,
            grid=(M // tm,),
            in_specs=[
                pl.BlockSpec((tm, C), lambda i: (i, 0)),   # x rows
                pl.BlockSpec((1, C), lambda i: (0, 0)),    # ln1 gamma
                pl.BlockSpec((1, C), lambda i: (0, 0)),    # ln1 beta
                pl.BlockSpec((C, O), lambda i: (0, 0)),    # W_qkv (resident)
                pl.BlockSpec((1, O), lambda i: (0, 0)),    # b_qkv
            ],
            out_specs=pl.BlockSpec((tm, O), lambda i: (i, 0)),
        ),
        compiler_params=pltpu.CompilerParams(
            dimension_semantics=("parallel",),
            vmem_limit_bytes=_VMEM_LIMIT),
    )(x2, g.reshape(1, C), b.reshape(1, C), w_qkv, b_qkv.reshape(1, O))


# ----------------------------------------------------------------------------
# Kernel B: causal flash attention (online softmax), batch dim = B * n_head
# ----------------------------------------------------------------------------
def _flash_causal_kernel(q_ref, k_ref, v_ref, o_ref, m_sc, l_sc, acc_sc,
                         *, tq, tk, scale):
    qi = pl.program_id(0)
    ki = pl.program_id(1)

    @pl.when(ki == 0)
    def _():
        m_sc[...] = jnp.full(m_sc.shape, -1e30, jnp.float32)
        l_sc[...] = jnp.zeros(l_sc.shape, jnp.float32)
        acc_sc[...] = jnp.zeros(acc_sc.shape, jnp.float32)

    # Skip kv tiles that lie entirely above the causal diagonal.
    @pl.when(ki * tk < (qi + 1) * tq)
    def _():
        q = q_ref[...].astype(jnp.float32) * scale
        k = k_ref[...].astype(jnp.float32)
        v = v_ref[...]
        s = jnp.einsum('bqd,bkd->bqk', q, k,
                       preferred_element_type=jnp.float32)
        q_pos = qi * tq + lax.broadcasted_iota(jnp.int32, (tq, tk), 0)
        k_pos = ki * tk + lax.broadcasted_iota(jnp.int32, (tq, tk), 1)
        s = jnp.where((q_pos >= k_pos)[None, :, :], s, -1e30)

        m_new = jnp.maximum(m_sc[...], s.max(axis=-1, keepdims=True))
        alpha = jnp.exp(m_sc[...] - m_new)
        p = jnp.exp(s - m_new)
        l_sc[...] = alpha * l_sc[...] + p.sum(axis=-1, keepdims=True)
        acc_sc[...] = alpha * acc_sc[...] + jnp.einsum(
            'bqk,bkd->bqd', p.astype(v.dtype), v,
            preferred_element_type=jnp.float32)
        m_sc[...] = m_new

    @pl.when(ki == pl.num_programs(1) - 1)
    def _():
        o_ref[...] = (acc_sc[...] / l_sc[...]).astype(o_ref.dtype)


def _causal_flash_attention(q, k, v):
    BH, T, D = q.shape
    tq = _pick_tile(T, (128, 64, 32, 16, 8))
    tk = _pick_tile(T, (128, 64, 32, 16, 8))
    scale = 1.0 / math.sqrt(D)
    kernel = functools.partial(_flash_causal_kernel, tq=tq, tk=tk, scale=scale)
    return pl.pallas_call(
        kernel,
        out_shape=jax.ShapeDtypeStruct((BH, T, D), q.dtype),
        grid_spec=pltpu.PrefetchScalarGridSpec(
            num_scalar_prefetch=0,
            grid=(T // tq, T // tk),
            in_specs=[
                pl.BlockSpec((BH, tq, D), lambda qi, ki: (0, qi, 0)),
                pl.BlockSpec((BH, tk, D), lambda qi, ki: (0, ki, 0)),
                pl.BlockSpec((BH, tk, D), lambda qi, ki: (0, ki, 0)),
            ],
            out_specs=pl.BlockSpec((BH, tq, D), lambda qi, ki: (0, qi, 0)),
            scratch_shapes=[
                pltpu.VMEM((BH, tq, 1), jnp.float32),   # running max
                pltpu.VMEM((BH, tq, 1), jnp.float32),   # running sum
                pltpu.VMEM((BH, tq, D), jnp.float32),   # output accumulator
            ],
        ),
        compiler_params=pltpu.CompilerParams(
            dimension_semantics=("parallel", "arbitrary"),
            vmem_limit_bytes=_VMEM_LIMIT),
    )(q, k, v)


# ----------------------------------------------------------------------------
# Kernel C: attention output projection + residual add
# ----------------------------------------------------------------------------
def _attn_proj_residual_kernel(y_ref, res_ref, w_ref, b_ref, o_ref):
    y = jnp.dot(y_ref[...].astype(w_ref.dtype), w_ref[...],
                preferred_element_type=jnp.float32)
    o_ref[...] = (y + b_ref[...] +
                  res_ref[...].astype(jnp.float32)).astype(o_ref.dtype)


def _attn_proj_residual(y2, res2, w, b):
    M, C = y2.shape
    tm = _pick_tile(M, (512, 256, 128, 64, 32, 16, 8))
    return pl.pallas_call(
        _attn_proj_residual_kernel,
        out_shape=jax.ShapeDtypeStruct((M, C), res2.dtype),
        grid_spec=pltpu.PrefetchScalarGridSpec(
            num_scalar_prefetch=0,
            grid=(M // tm,),
            in_specs=[
                pl.BlockSpec((tm, C), lambda i: (i, 0)),   # attn output rows
                pl.BlockSpec((tm, C), lambda i: (i, 0)),   # residual rows
                pl.BlockSpec((C, C), lambda i: (0, 0)),    # W_proj (resident)
                pl.BlockSpec((1, C), lambda i: (0, 0)),    # b_proj
            ],
            out_specs=pl.BlockSpec((tm, C), lambda i: (i, 0)),
        ),
        compiler_params=pltpu.CompilerParams(
            dimension_semantics=("parallel",),
            vmem_limit_bytes=_VMEM_LIMIT),
    )(y2, res2, w, b.reshape(1, C))


# ----------------------------------------------------------------------------
# Kernel D: ln_2 + MLP (c_fc -> GELU(tanh) -> c_proj) + residual add
#   grid = (M // tm, H // th); hidden axis is the reduction into a f32
#   (tm, C) accumulator, so weight slabs stay small (v7x-friendly).
# ----------------------------------------------------------------------------
def _ln_mlp_residual_kernel(x_ref, g_ref, b_ref, wfc_ref, bfc_ref,
                            wproj_ref, bproj_ref, o_ref, xn_ref, acc_ref):
    h_idx = pl.program_id(1)

    @pl.when(h_idx == 0)
    def _():
        xn = _layernorm(x_ref[...].astype(jnp.float32), g_ref[...], b_ref[...])
        xn_ref[...] = xn.astype(xn_ref.dtype)     # bf16 scratch -> MXU-ready
        acc_ref[...] = jnp.zeros(acc_ref.shape, acc_ref.dtype)

    h = jnp.dot(xn_ref[...], wfc_ref[...], preferred_element_type=jnp.float32)
    h = h + bfc_ref[...]
    # GELU with tanh approximation (matches torch.nn.GELU(approximate='tanh'))
    h = 0.5 * h * (1.0 + jnp.tanh(_GELU_C * (h + 0.044715 * h * h * h)))
    acc_ref[...] += jnp.dot(h.astype(wproj_ref.dtype), wproj_ref[...],
                            preferred_element_type=jnp.float32)

    @pl.when(h_idx == pl.num_programs(1) - 1)
    def _():
        y = acc_ref[...] + bproj_ref[...] + x_ref[...].astype(jnp.float32)
        o_ref[...] = y.astype(o_ref.dtype)


def _ln_mlp_residual(x2, g, b, w_fc, b_fc, w_proj, b_proj, *, mxu_dtype):
    M, C = x2.shape
    H = w_fc.shape[1]
    tm = _pick_tile(M, (512, 256, 128, 64, 32, 16, 8))
    th = _pick_tile(H, (512, 256, 128))

    if mxu_dtype is not None:
        w_fc = w_fc.astype(mxu_dtype)      # cast once outside the kernel
        w_proj = w_proj.astype(mxu_dtype)
    xn_dtype = mxu_dtype if mxu_dtype is not None else x2.dtype

    flops = 4 * M * C * H
    bytes_accessed = (2 * M * C * x2.dtype.itemsize
                      + w_fc.size * w_fc.dtype.itemsize
                      + w_proj.size * w_proj.dtype.itemsize
                      + 4 * (b_fc.size + b_proj.size + g.size + b.size))
    cost = pl.CostEstimate(flops=flops, transcendentals=M * H,
                           bytes_accessed=bytes_accessed)

    return pl.pallas_call(
        _ln_mlp_residual_kernel,
        out_shape=jax.ShapeDtypeStruct((M, C), x2.dtype),
        grid_spec=pltpu.PrefetchScalarGridSpec(
            num_scalar_prefetch=0,
            grid=(M // tm, H // th),
            in_specs=[
                pl.BlockSpec((tm, C), lambda i, h: (i, 0)),   # x rows (LN in + residual)
                pl.BlockSpec((1, C), lambda i, h: (0, 0)),    # ln2 gamma
                pl.BlockSpec((1, C), lambda i, h: (0, 0)),    # ln2 beta
                pl.BlockSpec((C, th), lambda i, h: (0, h)),   # W_fc hidden slice
                pl.BlockSpec((1, th), lambda i, h: (0, h)),   # b_fc hidden slice
                pl.BlockSpec((th, C), lambda i, h: (h, 0)),   # W_proj hidden slice
                pl.BlockSpec((1, C), lambda i, h: (0, 0)),    # b_proj
            ],
            out_specs=pl.BlockSpec((tm, C), lambda i, h: (i, 0)),
            scratch_shapes=[
                pltpu.VMEM((tm, C), xn_dtype),     # normalized activations
                pltpu.VMEM((tm, C), jnp.float32),  # f32 accumulator
            ],
        ),
        compiler_params=pltpu.CompilerParams(
            dimension_semantics=("parallel", "arbitrary"),
            vmem_limit_bytes=_VMEM_LIMIT),
        cost_estimate=cost,
    )(x2, g.reshape(1, C), b.reshape(1, C), w_fc, b_fc.reshape(1, H),
      w_proj, b_proj.reshape(1, C))


# ----------------------------------------------------------------------------
# Full Block forward
# ----------------------------------------------------------------------------
def block_forward(x, params, *, mxu_dtype=jnp.bfloat16):
    B, T, C = x.shape
    nH = params["n_head"]
    D = C // nH
    M = B * T
    x2 = x.reshape(M, C)

    # x + attn(ln_1(x))
    qkv = _ln_qkv(x2, params["ln1_g"], params["ln1_b"],
                  params["w_qkv"], params["b_qkv"]).reshape(B, T, 3 * C)
    q, k, v = jnp.split(qkv, 3, axis=-1)

    def heads(t):
        return t.reshape(B, T, nH, D).transpose(0, 2, 1, 3).reshape(B * nH, T, D)

    y = _causal_flash_attention(heads(q), heads(k), heads(v))
    y = y.reshape(B, nH, T, D).transpose(0, 2, 1, 3).reshape(M, C)
    x1 = _attn_proj_residual(y, x2, params["w_attn_proj"], params["b_attn_proj"])

    # x + mlp(ln_2(x))
    out = _ln_mlp_residual(x1, params["ln2_g"], params["ln2_b"],
                           params["w_fc"], params["b_fc"],
                           params["w_proj"], params["b_proj"],
                           mxu_dtype=mxu_dtype)
    return out.reshape(B, T, C)


# ----------------------------------------------------------------------------
# Pure-JAX reference (mirrors the PyTorch Block forward)
# ----------------------------------------------------------------------------
def _reference_block(x, params):
    B, T, C = x.shape
    nH = params["n_head"]
    D = C // nH

    def ln(t, g, b):
        mu = t.mean(-1, keepdims=True)
        var = ((t - mu) ** 2).mean(-1, keepdims=True)
        return (t - mu) / jnp.sqrt(var + _LN_EPS) * g + b

    h = ln(x, params["ln1_g"], params["ln1_b"])
    qkv = h @ params["w_qkv"] + params["b_qkv"]
    q, k, v = jnp.split(qkv, 3, axis=-1)
    q = q.reshape(B, T, nH, D).transpose(0, 2, 1, 3)
    k = k.reshape(B, T, nH, D).transpose(0, 2, 1, 3)
    v = v.reshape(B, T, nH, D).transpose(0, 2, 1, 3)
    s = (q @ k.transpose(0, 1, 3, 2)) / math.sqrt(D)
    mask = jnp.tril(jnp.ones((T, T), dtype=bool))
    s = jnp.where(mask, s, -jnp.inf)
    p = jax.nn.softmax(s, axis=-1)
    y = (p @ v).transpose(0, 2, 1, 3).reshape(B, T, C)
    y = y @ params["w_attn_proj"] + params["b_attn_proj"]
    x = x + y

    h2 = ln(x, params["ln2_g"], params["ln2_b"])
    ff = h2 @ params["w_fc"] + params["b_fc"]
    ff = 0.5 * ff * (1.0 + jnp.tanh(_GELU_C * (ff + 0.044715 * ff ** 3)))
    return x + ff @ params["w_proj"] + params["b_proj"]


if __name__ == "__main__":
    # Small GPT-2-style config (lane-dense C): n_embd=128, 4 heads, T=8, B=2.
    B, T, C, nH = 2, 8, 128, 4
    H = 4 * C
    std = 0.02

    key = jax.random.PRNGKey(0)
    ks = jax.random.split(key, 13)

    params = {
        "n_head": nH,
        "ln1_g": 1.0 + 0.1 * jax.random.normal(ks[0], (C,), jnp.float32),
        "ln1_b": 0.02 * jax.random.normal(ks[1], (C,), jnp.float32),
        "w_qkv": std * jax.random.normal(ks[2], (C, 3 * C), jnp.float32),
        "b_qkv": 0.01 * jax.random.normal(ks[3], (3 * C,), jnp.float32),
        "w_attn_proj": std * jax.random.normal(ks[4], (C, C), jnp.float32),
        "b_attn_proj": 0.01 * jax.random.normal(ks[5], (C,), jnp.float32),
        "ln2_g": 1.0 + 0.1 * jax.random.normal(ks[6], (C,), jnp.float32),
        "ln2_b": 0.02 * jax.random.normal(ks[7], (C,), jnp.float32),
        "w_fc": std * jax.random.normal(ks[8], (C, H), jnp.float32),
        "b_fc": 0.01 * jax.random.normal(ks[9], (H,), jnp.float32),
        "w_proj": std * jax.random.normal(ks[10], (H, C), jnp.float32),
        "b_proj": 0.01 * jax.random.normal(ks[11], (C,), jnp.float32),
    }
    x = jax.random.normal(ks[12], (B, T, C), dtype=jnp.float32)

    y = block_forward(x, params)            # bf16 MXU operands in the MLP
    y = jax.block_until_ready(y)

    y_ref = _reference_block(x, params)
    assert y.shape == x.shape
    assert jnp.allclose(y, y_ref, atol=1e-2, rtol=1e-2), (
        f"mismatch vs reference, max abs diff = {jnp.max(jnp.abs(y - y_ref))}")

    print("KERNEL_OK")
</pallas_src>

<mosaic_0001>
module attributes {stable_mosaic.version = 11 : i64} {
  func.func @_ln_qkv_kernel(%arg0: i32, %arg1: memref<16x128xf32, #tpu.memory_space<vmem>>, %arg2: memref<1x128xf32, #tpu.memory_space<vmem>>, %arg3: memref<1x128xf32, #tpu.memory_space<vmem>>, %arg4: memref<128x384xf32, #tpu.memory_space<vmem>>, %arg5: memref<1x384xf32, #tpu.memory_space<vmem>>, %arg6: memref<16x384xf32, #tpu.memory_space<vmem>>) attributes {dimension_semantics = [#tpu.dimension_semantics<parallel>], iteration_bounds = array<i64: 1>, scalar_prefetch = 0 : i64, scratch_operands = 0 : i64, tpu.core_type = #tpu.core_type<tc>, window_params = [{transform_indices = @transform_0, window_bounds = array<i64: 16, 128>}, {pipeline_mode = #tpu.pipeline_mode<synchronous>, transform_indices = @transform_1, window_bounds = array<i64: 1, 128>}, {pipeline_mode = #tpu.pipeline_mode<synchronous>, transform_indices = @transform_2, window_bounds = array<i64: 1, 128>}, {pipeline_mode = #tpu.pipeline_mode<synchronous>, transform_indices = @transform_3, window_bounds = array<i64: 128, 384>}, {pipeline_mode = #tpu.pipeline_mode<synchronous>, transform_indices = @transform_4, window_bounds = array<i64: 1, 384>}, {transform_indices = @transform_5, window_bounds = array<i64: 16, 384>}]} {
    %c0 = arith.constant 0 : index
    %c0_0 = arith.constant 0 : index
    %0 = vector.load %arg1[%c0, %c0_0] : memref<16x128xf32, #tpu.memory_space<vmem>>, vector<16x128xf32>
    %c0_1 = arith.constant 0 : index
    %c0_2 = arith.constant 0 : index
    %1 = vector.load %arg2[%c0_1, %c0_2] : memref<1x128xf32, #tpu.memory_space<vmem>>, vector<1x128xf32>
    %c0_3 = arith.constant 0 : index
    %c0_4 = arith.constant 0 : index
    %2 = vector.load %arg3[%c0_3, %c0_4] : memref<1x128xf32, #tpu.memory_space<vmem>>, vector<1x128xf32>
    %cst = arith.constant dense<0.000000e+00> : vector<16xf32>
    %3 = vector.multi_reduction <add>, %0, %cst [1] : vector<16x128xf32> to vector<16xf32>
    %4 = vector.shape_cast %3 : vector<16xf32> to vector<16x1xf32>
    %cst_5 = arith.constant 1.280000e+02 : f32
    %5 = vector.broadcast %cst_5 : f32 to vector<16x1xf32>
    %6 = arith.divf %4, %5 : vector<16x1xf32>
    %7 = vector.broadcast %6 : vector<16x1xf32> to vector<16x128xf32>
    %8 = arith.subf %0, %7 : vector<16x128xf32>
    %9 = arith.mulf %8, %8 : vector<16x128xf32>
    %cst_6 = arith.constant dense<0.000000e+00> : vector<16xf32>
    %10 = vector.multi_reduction <add>, %9, %cst_6 [1] : vector<16x128xf32> to vector<16xf32>
    %11 = vector.shape_cast %10 : vector<16xf32> to vector<16x1xf32>
    %cst_7 = arith.constant 1.280000e+02 : f32
    %12 = vector.broadcast %cst_7 : f32 to vector<16x1xf32>
    %13 = arith.divf %11, %12 : vector<16x1xf32>
    %cst_8 = arith.constant 9.99999974E-6 : f32
    %14 = vector.broadcast %cst_8 : f32 to vector<16x1xf32>
    %15 = arith.addf %13, %14 : vector<16x1xf32>
    %16 = math.rsqrt %15 : vector<16x1xf32>
    %17 = vector.broadcast %16 : vector<16x1xf32> to vector<16x128xf32>
    %18 = arith.mulf %8, %17 : vector<16x128xf32>
    %19 = vector.broadcast %1 : vector<1x128xf32> to vector<16x128xf32>
    %20 = arith.mulf %18, %19 : vector<16x128xf32>
    %21 = vector.broadcast %2 : vector<1x128xf32> to vector<16x128xf32>
    %22 = arith.addf %20, %21 : vector<16x128xf32>
    %c0_9 = arith.constant 0 : index
    %c0_10 = arith.constant 0 : index
    %23 = vector.load %arg4[%c0_9, %c0_10] : memref<128x384xf32, #tpu.memory_space<vmem>>, vector<128x384xf32>
    %cst_11 = arith.constant dense<0.000000e+00> : vector<16x384xf32>
    %24 = tpu.matmul %22, %23, %cst_11 {dimension_numbers = #tpu.dot_dimension_numbers<[1], [0], [0], [1], [0, 0, 1, 1], [], []>} : vector<16x128xf32>, vector<128x384xf32>, vector<16x384xf32> -> vector<16x384xf32>
    %c0_12 = arith.constant 0 : index
    %c0_13 = arith.constant 0 : index
    %25 = vector.load %arg5[%c0_12, %c0_13] : memref<1x384xf32, #tpu.memory_space<vmem>>, vector<1x384xf32>
    %26 = vector.broadcast %25 : vector<1x384xf32> to vector<16x384xf32>
    %27 = arith.addf %24, %26 : vector<16x384xf32>
    %c0_14 = arith.constant 0 : index
    %c0_15 = arith.constant 0 : index
    %28 = vector.load %arg6[%c0_14, %c0_15] : memref<16x384xf32, #tpu.memory_space<vmem>>, vector<16x384xf32>
    tpu.vector_store %arg6[%c0_14, %c0_15], %27 {strides = array<i32>} : memref<16x384xf32, #tpu.memory_space<vmem>>, vector<16x384xf32>,
    return
  }
  func.func @transform_0(%arg0: i32) -> (i32, i32) {
    %c0_i32 = arith.constant 0 : i32
    %c0_i32_0 = arith.constant 0 : i32
    return %arg0, %c0_i32 : i32, i32
  }
  func.func @transform_1(%arg0: i32) -> (i32, i32) {
    %c0_i32 = arith.constant 0 : i32
    %c0_i32_0 = arith.constant 0 : i32
    %c0_i32_1 = arith.constant 0 : i32
    return %c0_i32, %c0_i32_0 : i32, i32
  }
  func.func @transform_2(%arg0: i32) -> (i32, i32) {
    %c0_i32 = arith.constant 0 : i32
    %c0_i32_0 = arith.constant 0 : i32
    %c0_i32_1 = arith.constant 0 : i32
    return %c0_i32, %c0_i32_0 : i32, i32
  }
  func.func @transform_3(%arg0: i32) -> (i32, i32) {
    %c0_i32 = arith.constant 0 : i32
    %c0_i32_0 = arith.constant 0 : i32
    %c0_i32_1 = arith.constant 0 : i32
    return %c0_i32, %c0_i32_0 : i32, i32
  }
  func.func @transform_4(%arg0: i32) -> (i32, i32) {
    %c0_i32 = arith.constant 0 : i32
    %c0_i32_0 = arith.constant 0 : i32
    %c0_i32_1 = arith.constant 0 : i32
    return %c0_i32, %c0_i32_0 : i32, i32
  }
  func.func @transform_5(%arg0: i32) -> (i32, i32) {
    %c0_i32 = arith.constant 0 : i32
    %c0_i32_0 = arith.constant 0 : i32
    return %arg0, %c0_i32 : i32, i32
  }
}

</mosaic_0001>

<bundles_post_ra>
// kernel: tpu_custom_call.1
= control target key start
LH: loop header
LB: loop body
LE: loop exit
PB: predicated region body
PF: predicated region fallthrough
CT: control target
= control target key end

     0   :  { %10 = vsyncpa [#allocation3], 0  ;;  %s535_s0 = inlined_call_operand.hbm [shape: f32[16,128], index: 0, kind: input, shape index: {}]   ;;  %s536_s1 = inlined_call_operand.hbm [shape: f32[1,128], index: 1, kind: input, shape index: {}]   ;;  %s537_s2 = inlined_call_operand.hbm [shape: f32[1,128], index: 2, kind: input, shape index: {}]   ;;  %s538_s3 = inlined_call_operand.hbm [shape: f32[128,384], index: 3, kind: input, shape index: {}]   ;;  %s539_s4 = inlined_call_operand.vmem [shape: f32[1,384], index: 4, kind: input, shape index: {}]   ;;  %s540_s5 = inlined_call_operand.hbm [shape: f32[16,384], index: 5, kind: output, shape index: {}]  }
   0x1   :  { %11 = vsyncpa [#allocation6], 0 }
   0x2   :  { %12 = vsyncpa [#allocation9], 0  ;;  %s32_s20 = sshll.u32 %s536_s1, 4  ;;  %s33_s20 = int_to_ptr.hbm [resolvable:$true] %s32_s20 }
   0x3   :  { %13 = vsyncpa [#allocation4], 0  ;;  %s455_s21 = smov [#allocation5]   ;;  %s18_s25 = sshll.u32 %s535_s0, 4  ;;  %s19_s25 = int_to_ptr.hbm [resolvable:$true] %s18_s25 }
   0x4   :  { %s34_s22 = sshll.u32 %s455_s21, 4  ;;  %s456_s26 = smov [#allocation2]   ;;  %s35_s22 = int_to_ptr.vmem [resolvable:$true] %s34_s22 }
   0x5   :  { %37 = dma.hbm_to_vmem [thread:$0]  %s33_s20, 16, %s35_s22, [#allocation6]  }
   0x6   :  { %s20_s27 = sshll.u32 %s456_s26, 4  ;;  %s457_s28 = smov 128   ;;  %s21_s27 = int_to_ptr.vmem [resolvable:$true] %s20_s27 }
   0x7   :  { %s458_s29 = smov 8   ;;  %s43_s1 = sshll.u32 %s537_s2, 4  ;;  %s44_s1 = int_to_ptr.hbm [resolvable:$true] %s43_s1 }
   0x8   :  { %26 = dma.hbm_to_vmem [thread:$0]  %s19_s25, 256, %s21_s27, [#allocation3], %s457_s28, %s457_s28, %s458_s29  }
   0x9   :  { %s459_s7 = smov [#allocation7]   ;;  %s53_s0 = sshll.u32 %s538_s3, 4  ;;  %s54_s0 = int_to_ptr.hbm [resolvable:$true] %s53_s0 }
   0xa   :  { %s45_s8 = sshll.u32 %s459_s7, 4  ;;  %s460_s11 = smov [#allocation8]   ;;  %s46_s8 = int_to_ptr.vmem [resolvable:$true] %s45_s8 }
   0xb   :  { %48 = dma.hbm_to_vmem [thread:$0]  %s44_s1, 16, %s46_s8, [#allocation6]  }
   0xc   :  { %s55_s12 = sshll.u32 %s460_s11, 4  ;;  %s461_s13 = smov 384   ;;  %s56_s12 = int_to_ptr.vmem [resolvable:$true] %s55_s12 }
   0xd   :  { %s462_s14 = smov 24  }
   0xe   :  { %61 = dma.hbm_to_vmem [thread:$0]  %s54_s0, 6144, %s56_s12, [#allocation9], %s461_s13, %s461_s13, %s462_s14  }
   0xf   :  { %447 = dma.done.wait [#allocation3], 256  }
  0x10   :  { %448 = vsyncadd [#allocation3], 4294967040 }
  0x11   :  { %449 = dma.done.wait [#allocation6], 32  }
  0x12   :  { %450 = vsyncadd [#allocation6], 4294967264 }
  0x13   :  { %451 = dma.done.wait [#allocation9], 6144  }
  0x14   :  { %452 = vsyncadd [#allocation9], 4294961152  ;;  %v80_v0 = vld [vmem:[#allocation2] sm:$0xff]  ;;  %v81_v1 = vld [vmem:[#allocation2 + $0x8] sm:$0xff]  ;;  %v463_v2 = vmov 128.0   ;;  %s464_s15 = smov [#allocation10]  }
  0x15   :  { %84 = vadd.xlane.f32.xlu0 %v80_v0  ;;  %321 = vrcp.f32 %v463_v2  ;;  %v186_v5 = vld [vmem:[#allocation8 + $0x168] sm:$0xff]  ;;  %v187_v6 = vld [vmem:[#allocation8 + $0x170] sm:$0xff]  ;;  %v188_v7 = vld [vmem:[#allocation8 + $0x178] sm:$0xff]  ;;  %s276_s16 = sshll.u32 %s464_s15, 4  ;;  %s277_s16 = int_to_ptr.vmem [resolvable:$true] %s276_s16 }
  0x16   :  { %197 = vmatpush.msra.mxu0 %v186_v5  ;;  %220 = vmatpush.msra.mxu1 %v187_v6  ;;  %v183_v8 = vld [vmem:[#allocation8 + $0x150] sm:$0xff]  ;;  %v184_v9 = vld [vmem:[#allocation8 + $0x158] sm:$0xff]  ;;  %v185_v10 = vld [vmem:[#allocation8 + $0x160] sm:$0xff] }
  0x17   :  { %243 = vmatpush.msra.mxu2 %v188_v7  ;;  %293 = vmatpush.msra.mxu3 %v186_v5  ;;  %v180_v23 = vld [vmem:[#allocation8 + $0x138] sm:$0xff]  ;;  %v181_v24 = vld [vmem:[#allocation8 + $0x140] sm:$0xff]  ;;  %v182_v25 = vld [vmem:[#allocation8 + $0x148] sm:$0xff] }
  0x18   :  { %198 = vmatpush.msra.mxu0 %v183_v8  ;;  %221 = vmatpush.msra.mxu1 %v184_v9  ;;  %v177_v26 = vld [vmem:[#allocation8 + $0x120] sm:$0xff]  ;;  %v178_v27 = vld [vmem:[#allocation8 + $0x128] sm:$0xff]  ;;  %v179_v28 = vld [vmem:[#allocation8 + $0x130] sm:$0xff] }
  0x19   :  { %244 = vmatpush.msra.mxu2 %v185_v10  ;;  %294 = vmatpush.msra.mxu3 %v183_v8  ;;  %v174_v29 = vld [vmem:[#allocation8 + $0x108] sm:$0xff]  ;;  %v175_v30 = vld [vmem:[#allocation8 + $0x110] sm:$0xff]  ;;  %v176_v31 = vld [vmem:[#allocation8 + $0x118] sm:$0xff] }
  0x1a   :  { %199 = vmatpush.msra.mxu0 %v180_v23  ;;  %222 = vmatpush.msra.mxu1 %v181_v24  ;;  %v171_v32 = vld [vmem:[#allocation8 + $0xf0] sm:$0xff]  ;;  %v172_v33 = vld [vmem:[#allocation8 + $0xf8] sm:$0xff]  ;;  %v173_v34 = vld [vmem:[#allocation8 + $0x100] sm:$0xff] }
  0x1b   :  { %v322_v3 = vpop.eup %321  ;;  %245 = vmatpush.msra.mxu2 %v182_v25  ;;  %295 = vmatpush.msra.mxu3 %v180_v23  ;;  %v168_v35 = vld [vmem:[#allocation8 + $0xd8] sm:$0xff]  ;;  %v169_v36 = vld [vmem:[#allocation8 + $0xe0] sm:$0xff]  ;;  %v170_v37 = vld [vmem:[#allocation8 + $0xe8] sm:$0xff] }
  0x1c   :  { %v89_v4 = vmul.f32 128.0, %v322_v3  ;;  %vm93_vm0 = vweird.f32 %v322_v3  ;;  %200 = vmatpush.msra.mxu0 %v177_v26  ;;  %223 = vmatpush.msra.mxu1 %v178_v27  ;;  %v165_v38 = vld [vmem:[#allocation8 + $0xc0] sm:$0xff]  ;;  %v166_v39 = vld [vmem:[#allocation8 + $0xc8] sm:$0xff]  ;;  %v167_v40 = vld [vmem:[#allocation8 + $0xd0] sm:$0xff] }
  0x1d   :  { %86 = vadd.xlane.f32.xlu0 %v81_v1  ;;  %246 = vmatpush.msra.mxu2 %v179_v28  ;;  %v162_v41 = vld [vmem:[#allocation8 + $0xa8] sm:$0xff]  ;;  %v163_v42 = vld [vmem:[#allocation8 + $0xb0] sm:$0xff]  ;;  %v164_v43 = vld [vmem:[#allocation8 + $0xb8] sm:$0xff] }
  0x1e   :  { %v90_v11 = vsub.f32 1.0, %v89_v4  ;;  %296 = vmatpush.msra.mxu3 %v177_v26  ;;  %201 = vmatpush.msra.mxu0 %v174_v29  ;;  %v159_v44 = vld [vmem:[#allocation8 + $0x90] sm:$0xff]  ;;  %v160_v45 = vld [vmem:[#allocation8 + $0x98] sm:$0xff]  ;;  %v161_v46 = vld [vmem:[#allocation8 + $0xa0] sm:$0xff] }
  0x1f   :  { %224 = vmatpush.msra.mxu1 %v175_v30  ;;  %247 = vmatpush.msra.mxu2 %v176_v31  ;;  %v156_v47 = vld [vmem:[#allocation8 + $0x78] sm:$0xff]  ;;  %v157_v48 = vld [vmem:[#allocation8 + $0x80] sm:$0xff]  ;;  %v158_v49 = vld [vmem:[#allocation8 + $0x88] sm:$0xff] }
  0x20   :  { %v91_v12 = vmul.f32 %v322_v3, %v90_v11  ;;  %297 = vmatpush.msra.mxu3 %v174_v29  ;;  %202 = vmatpush.msra.mxu0 %v171_v32  ;;  %v153_v50 = vld [vmem:[#allocation8 + $0x60] sm:$0xff]  ;;  %v154_v51 = vld [vmem:[#allocation8 + $0x68] sm:$0xff]  ;;  %v155_v52 = vld [vmem:[#allocation8 + $0x70] sm:$0xff] }
  0x21   :  { %225 = vmatpush.msra.mxu1 %v172_v33  ;;  %248 = vmatpush.msra.mxu2 %v173_v34  ;;  %v150_v53 = vld [vmem:[#allocation8 + $0x48] sm:$0xff]  ;;  %v151_v54 = vld [vmem:[#allocation8 + $0x50] sm:$0xff]  ;;  %v152_v55 = vld [vmem:[#allocation8 + $0x58] sm:$0xff] }
  0x22   :  { %v92_v13 = vadd.f32 %v322_v3, %v91_v12  ;;  %298 = vmatpush.msra.mxu3 %v171_v32  ;;  %203 = vmatpush.msra.mxu0 %v168_v35  ;;  %v147_v56 = vld [vmem:[#allocation8 + $0x30] sm:$0xff]  ;;  %v148_v57 = vld [vmem:[#allocation8 + $0x38] sm:$0xff]  ;;  %v149_v58 = vld [vmem:[#allocation8 + $0x40] sm:$0xff] }
  0x23   :  { %226 = vmatpush.msra.mxu1 %v169_v36  ;;  %249 = vmatpush.msra.mxu2 %v170_v37  ;;  %v144_v59 = vld [vmem:[#allocation8 + $0x18] sm:$0xff]  ;;  %v145_v60 = vld [vmem:[#allocation8 + $0x20] sm:$0xff]  ;;  %v146_v61 = vld [vmem:[#allocation8 + $0x28] sm:$0xff] }
  0x24   :  { %v510_v14 = vsel %vm93_vm0, %v322_v3, %v92_v13  ;;  %299 = vmatpush.msra.mxu3 %v168_v35  ;;  %204 = vmatpush.msra.mxu0 %v165_v38  ;;  %v141_v62 = vld [vmem:[#allocation8] sm:$0xff]  ;;  %v142_v63 = vld [vmem:[#allocation8 + $0x8] sm:$0xff] }
  0x25   :  { %227 = vmatpush.msra.mxu1 %v166_v39  ;;  %250 = vmatpush.msra.mxu2 %v167_v40 }
  0x26   :  { %300 = vmatpush.msra.mxu3 %v165_v38  ;;  %205 = vmatpush.msra.mxu0 %v162_v41 }
  0x27   :  { %228 = vmatpush.msra.mxu1 %v163_v42  ;;  %251 = vmatpush.msra.mxu2 %v164_v43 }
  0x28   :  { %301 = vmatpush.msra.mxu3 %v162_v41  ;;  %206 = vmatpush.msra.mxu0 %v159_v44 }
  0x29   :  { %229 = vmatpush.msra.mxu1 %v160_v45  ;;  %252 = vmatpush.msra.mxu2 %v161_v46 }
  0x2a   :  { %302 = vmatpush.msra.mxu3 %v159_v44  ;;  %207 = vmatpush.msra.mxu0 %v156_v47 }
  0x2b   :  { %230 = vmatpush.msra.mxu1 %v157_v48  ;;  %253 = vmatpush.msra.mxu2 %v158_v49 }
  0x2c   :  { %303 = vmatpush.msra.mxu3 %v156_v47  ;;  %208 = vmatpush.msra.mxu0 %v153_v50 }
  0x2d   :  { %231 = vmatpush.msra.mxu1 %v154_v51  ;;  %254 = vmatpush.msra.mxu2 %v155_v52 }
  0x2e   :  { %304 = vmatpush.msra.mxu3 %v153_v50  ;;  %209 = vmatpush.msra.mxu0 %v150_v53 }
  0x2f   :  { %232 = vmatpush.msra.mxu1 %v151_v54  ;;  %255 = vmatpush.msra.mxu2 %v152_v55 }
  0x30   :  { %305 = vmatpush.msra.mxu3 %v150_v53  ;;  %210 = vmatpush.msra.mxu0 %v147_v56 }
  0x31   :  { %233 = vmatpush.msra.mxu1 %v148_v57  ;;  %256 = vmatpush.msra.mxu2 %v149_v58 }
  0x32   :  { %306 = vmatpush.msra.mxu3 %v147_v56  ;;  %211 = vmatpush.msra.mxu0 %v144_v59 }
  0x33   :  { %234 = vmatpush.msra.mxu1 %v145_v60  ;;  %257 = vmatpush.msra.mxu2 %v146_v61 }
  0x34   :  { %307 = vmatpush.msra.mxu3 %v144_v59  ;;  %212 = vmatpush.msra.mxu0 %v141_v62 }
  0x35   :  { %235 = vmatpush.msra.mxu1 %v142_v63 }
  0x36   :  { %308 = vmatpush.msra.mxu3 %v141_v62 }
  0x88   :  { %v85_v15 = vpop.xlane.xlu0 %84 }
  0x89   :  { %v95_v16 = vmul.f32 %v510_v14, %v85_v15 }
  0x8b   :  { %v513_v17 = vsub.f32 %v80_v0, %v95_v16  ;;  %v143_v0 = vld [vmem:[#allocation8 + $0x10] sm:$0xff]  ;;  %v319_v16 = vld [vmem:[#allocation5] ss:$0 sm:$0xff] }
  0x8c   :  { %258 = vmatpush.msra.mxu2 %v143_v0 }
  0x8d   :  { %v99_v18 = vmul.f32 %v513_v17, %v513_v17 }
  0x8f   :  { %101 = vadd.xlane.f32.xlu1 %v99_v18 }
  0x90   :  { %v87_v19 = vpop.xlane.xlu0 %86 }
  0x91   :  { %v96_v20 = vmul.f32 %v510_v14, %v87_v19 }
  0x93   :  { %v518_v21 = vsub.f32 %v81_v1, %v96_v20 }
  0x95   :  { %v100_v22 = vmul.f32 %v518_v21, %v518_v21 }
  0x97   :  { %103 = vadd.xlane.f32.xlu1 %v100_v22  ;;  %v320_v22 = vld [vmem:[#allocation7] ss:$0 sm:$0xff] }
 0x102   :  { %v102_v1 = vpop.xlane.xlu1 %101 }
 0x103   :  { %v105_v2 = vmul.f32 %v102_v1, %v510_v14 }
 0x105   :  { %v107_v3 = vadd.f32 1e-05, %v105_v2 }
 0x107   :  { %323 = vrsqrt.f32 %v107_v3  ;;  %vm115_vm2 = vweird.f32 %v107_v3 }
 0x10a   :  { %v104_v4 = vpop.xlane.xlu1 %103 }
 0x10b   :  { %v106_v5 = vmul.f32 %v104_v4, %v510_v14 }
 0x10d   :  { %v324_v6 = vpop.eup %323  ;;  %v108_v7 = vadd.f32 1e-05, %v106_v5 }
 0x10e   :  { %v110_v8 = vmul.f32 %v324_v6, %v107_v3  ;;  %vm116_vm1 = vweird.f32 %v324_v6 }
 0x10f   :  { %325 = vrsqrt.f32 %v108_v7  ;;  %vm117_vm3 = vmor %vm115_vm2, %vm116_vm1  ;;  %vm125_vm5 = vweird.f32 %v108_v7 }
 0x110   :  { %v111_v9 = vmul.f32 %v324_v6, %v110_v8 }
 0x112   :  { %v112_v10 = vmul.f32 0.5, %v111_v9 }
 0x114   :  { %v113_v11 = vsub.f32 1.5, %v112_v10 }
 0x115   :  { %v326_v12 = vpop.eup %325 }
 0x116   :  { %v114_v13 = vmul.f32 %v324_v6, %v113_v11  ;;  %v120_v15 = vmul.f32 %v326_v12, %v108_v7  ;;  %vm126_vm4 = vweird.f32 %v326_v12 }
 0x117   :  { %vm127_vm6 = vmor %vm125_vm5, %vm126_vm4 }
 0x118   :  { %v118_v18 = vsel %vm117_vm3, %v324_v6, %v114_v13  ;;  %v121_v19 = vmul.f32 %v326_v12, %v120_v15 }
 0x119   :  { %v129_v20 = vmul.f32 %v118_v18, %v513_v17  ;;  %v189_v17 = vld [vmem:[%s539_s4] sm:$0x7]  ;;  %s278_s4 = sshll.u32 %s540_s5, 4  ;;  %s279_s4 = int_to_ptr.hbm [resolvable:$true] %s278_s4 }
 0x11a   :  { %v122_v14 = vmul.f32 0.5, %v121_v19  ;;  %v191_v31 = vperm.slane %v189_v17, 0  ;;  %v192_v32 = vperm.slane %v189_v17, 1  ;;  %v193_v37 = vperm.slane %v189_v17, 2 }
 0x11b   :  { %v134_v23 = vmul.f32 %v319_v16, %v129_v20 }
 0x11c   :  { %v123_v24 = vsub.f32 1.5, %v122_v14 }
 0x11d   :  { %v139_v25 = vadd.f32 %v320_v22, %v134_v23 }
 0x11e   :  { %v124_v26 = vmul.f32 %v326_v12, %v123_v24 }
 0x11f   :  { %213 = vmatmul.f32.vlgmr.msra.gmra.mxu0 %v139_v25  ;;  %236 = vmatmul.f32.vlgmr.msra.gmra.mxu1 %v139_v25 }
 0x120   :  { %v128_v27 = vsel %vm127_vm6, %v326_v12, %v124_v26  ;;  %259 = vmatmul.f32.vlgmr.msra.gmra.mxu2 %v139_v25 }
 0x121   :  { %v130_v28 = vmul.f32 %v128_v27, %v518_v21 }
 0x123   :  { %v135_v29 = vmul.f32 %v319_v16, %v130_v28 }
 0x125   :  { %v140_v30 = vadd.f32 %v320_v22, %v135_v29 }
 0x127   :  { %216 = vmatmul.f32.vlgmr.msra.gmra.mxu3 %v140_v30  ;;  %239 = vmatmul.f32.gmra.mxu1 %v140_v30 }
 0x128   :  { %262 = vmatmul.f32.gmra.mxu2 %v140_v30 }
 0x19c   :  { %v214_v33 = vpop.f32.mrf.mxu0  ;;  %v237_v34 = vpop.f32.mrf.mxu1 }
 0x19d   :  { %v215_v35 = vadd.f32 %v214_v33, %v191_v31  ;;  %v238_v36 = vadd.f32 %v237_v34, %v192_v32 }
 0x19f   :  { %266 = vst [vmem:[#allocation10] sm:$0xff] %v215_v35 }
 0x1a0   :  { %267 = vst [vmem:[#allocation10 + $0x8] sm:$0xff] %v238_v36 }
 0x1a3   :  { %v260_v38 = vpop.f32.mrf.mxu2 }
 0x1a4   :  { %v261_v21 = vadd.f32 %v260_v38, %v193_v37  ;;  %v240_v39 = vpop.f32.mrf.mxu1 }
 0x1a5   :  { %v241_v40 = vadd.f32 %v240_v39, %v192_v32 }
 0x1a6   :  { %268 = vst [vmem:[#allocation10 + $0x10] sm:$0xff] %v261_v21 }
 0x1a7   :  { %270 = vst [vmem:[#allocation10 + $0x20] sm:$0xff] %v241_v40 }
 0x1aa   :  { %v217_v41 = vpop.f32.mrf.mxu3 }
 0x1ab   :  { %v218_v42 = vadd.f32 %v217_v41, %v191_v31  ;;  %v263_v43 = vpop.f32.mrf.mxu2 }
 0x1ac   :  { %v264_v44 = vadd.f32 %v263_v43, %v193_v37 }
 0x1ad   :  { %269 = vst [vmem:[#allocation10 + $0x18] sm:$0xff] %v218_v42 }
 0x1ae   :  { %271 = vst [vmem:[#allocation10 + $0x28] sm:$0xff] %v264_v44 }
 0x1af   :  { %284 = dma.vmem_to_hbm [thread:$0]  %s277_s16, 768, %s279_s4, [#allocation4], %s461_s13, %s461_s13, %s462_s14  }
 0x1b0   :  { %453 = dma.done.wait [#allocation4], 768  }
 0x1b1   :  { %454 = vsyncadd [#allocation4], 4294966528 }
 0x1b2   :  { %289 = vsyncpa [#allocation3], 1 }
 0x1b3   :  { %290 = vsyncpa [#allocation6], 1 }
 0x1b4   :  { %291 = vsyncpa [#allocation9], 1 }
 0x1b5   :  { %292 = vsyncpa [#allocation4], 1 }

</bundles_post_ra>
